<compile_context>
chip_gen: v6e
topology: v6e:2x2x1
jax: 0.10.0
libtpu: 0.0.40
codegen_flags: <defaults>
</compile_context>

<pallas_src>
import functools

import jax
import jax.numpy as jnp
from jax.experimental import pallas as pl
from jax.experimental.pallas import tpu as pltpu


def _round_up(x, m):
    return (x + m - 1) // m * m


def _actor_kernel(state_ref, w1_ref, b1_ref, w2_ref, b2_ref,
                  wh_ref, bh_ref, eps_ref, out_ref, *, max_action, a_pad):
    x = state_ref[...]                                              # (TB, S) f32

    # l1 + ReLU  (bf16 MXU operands, f32 accumulation / elementwise)
    h1 = jnp.dot(x.astype(jnp.bfloat16), w1_ref[...],
                 preferred_element_type=jnp.float32) + b1_ref[...]
    h1 = jnp.maximum(h1, 0.0)

    # l2 + ReLU
    h2 = jnp.dot(h1.astype(jnp.bfloat16), w2_ref[...],
                 preferred_element_type=jnp.float32) + b2_ref[...]
    h2 = jnp.maximum(h2, 0.0)

    # Fused, lane-padded heads: columns [0:a_pad] = mean, [a_pad:2*a_pad] = sigma.
    heads = jnp.dot(h2.astype(jnp.bfloat16), wh_ref[...],
                    preferred_element_type=jnp.float32) + bh_ref[...]
    mean = max_action * jnp.tanh(heads[:, :a_pad])
    sig = jnp.logaddexp(heads[:, a_pad:], 0.0) + 0.001              # softplus

    # rsample + clamp (padded lanes carry zeros in eps -> discarded in wrapper)
    action = mean + sig * eps_ref[...]
    out_ref[...] = jnp.clip(action, -max_action, max_action)


def actor_forward(state, params, eps, max_action):
    """Fused Actor.forward. state: (B, S) f32, eps: (B, A) f32 -> (B, A) f32."""
    w1, b1, w2, b2, wm, bm, ws, bs = params
    B, S = state.shape
    H = w1.shape[1]
    A = wm.shape[1]

    A_PAD = 128                               # lane-dense width per head

    # Fuse + zero-pad the two heads into one (H, 2*A_PAD) weight / (1, 2*A_PAD) bias.
    wh = jnp.zeros((H, 2 * A_PAD), jnp.float32)
    wh = wh.at[:, :A].set(wm).at[:, A_PAD:A_PAD + A].set(ws)
    bh = jnp.zeros((1, 2 * A_PAD), jnp.float32)
    bh = bh.at[:, :A].set(bm).at[:, A_PAD:A_PAD + A].set(bs)

    # bf16 weights for the MXU (biases stay f32 for the VPU adds).
    w1b = w1.astype(jnp.bfloat16)
    w2b = w2.astype(jnp.bfloat16)
    whb = wh.astype(jnp.bfloat16)

    # Batch tiling: up to 256 rows per grid step, batch padded to a tile multiple.
    TB = min(256, _round_up(B, 8))
    B_pad = _round_up(B, TB)
    nb = B_pad // TB

    state_p = jnp.zeros((B_pad, S), jnp.float32).at[:B, :].set(state)
    eps_p = jnp.zeros((B_pad, A_PAD), jnp.float32).at[:B, :A].set(eps)

    batch_spec = lambda shp: pl.BlockSpec(shp, lambda i: (i, 0))
    const_spec = lambda shp: pl.BlockSpec(shp, lambda i: (0, 0))

    out = pl.pallas_call(
        functools.partial(_actor_kernel, max_action=float(max_action), a_pad=A_PAD),
        out_shape=jax.ShapeDtypeStruct((B_pad, A_PAD), jnp.float32),
        grid=(nb,),
        in_specs=[
            batch_spec((TB, S)),              # state
            const_spec((S, H)),               # w1 (bf16)
            const_spec((1, H)),               # b1
            const_spec((H, H)),               # w2 (bf16)
            const_spec((1, H)),               # b2
            const_spec((H, 2 * A_PAD)),       # fused head weight (bf16)
            const_spec((1, 2 * A_PAD)),       # fused head bias
            batch_spec((TB, A_PAD)),          # eps (lane-padded)
        ],
        out_specs=batch_spec((TB, A_PAD)),
        compiler_params=pltpu.CompilerParams(dimension_semantics=("parallel",)),
    )(state_p, w1b, b1, w2b, b2, whb, bh, eps_p)

    return out[:B, :A]


def init_actor_params(key, state_dim, action_dim, hidden=256):
    """Deterministic init mimicking PyTorch nn.Linear default U(-1/sqrt(fan_in), ...)."""
    ks = jax.random.split(key, 8)

    def lin(kw, kb, fan_in, fan_out):
        bound = 1.0 / jnp.sqrt(fan_in)
        w = jax.random.uniform(kw, (fan_in, fan_out), jnp.float32, -bound, bound)
        b = jax.random.uniform(kb, (1, fan_out), jnp.float32, -bound, bound)
        return w, b

    w1, b1 = lin(ks[0], ks[1], state_dim, hidden)
    w2, b2 = lin(ks[2], ks[3], hidden, hidden)
    wm, bm = lin(ks[4], ks[5], hidden, action_dim)
    ws, bs = lin(ks[6], ks[7], hidden, action_dim)
    return (w1, b1, w2, b2, wm, bm, ws, bs)


if __name__ == "__main__":
    key = jax.random.PRNGKey(0)
    k_param, k_state, k_eps = jax.random.split(key, 3)

    batch = 8
    state_dim = 16
    action_dim = 8
    max_action = 1.0

    params = init_actor_params(k_param, state_dim, action_dim)
    state = jax.random.normal(k_state, (batch, state_dim), jnp.float32)
    eps = jax.random.normal(k_eps, (batch, action_dim), jnp.float32)

    action = actor_forward(state, params, eps, max_action)
    jax.block_until_ready(action)

    # Reference in plain f32 JAX (kernel uses bf16 MXU operands -> loose tolerance).
    w1, b1, w2, b2, wm, bm, ws, bs = params
    a = jnp.maximum(state @ w1 + b1, 0.0)
    a = jnp.maximum(a @ w2 + b2, 0.0)
    mean = max_action * jnp.tanh(a @ wm + bm)
    sigma = jax.nn.softplus(a @ ws + bs) + 0.001
    ref = jnp.clip(mean + sigma * eps, -max_action, max_action)

    assert action.shape == (batch, action_dim)
    assert jnp.allclose(action, ref, atol=5e-2, rtol=5e-2), "mismatch vs reference"

    print("KERNEL_OK")
</pallas_src>

<mosaic_0001>
module attributes {stable_mosaic.version = 11 : i64} {
  func.func @_actor_kernel(%arg0: i32, %arg1: memref<8x16xf32, #tpu.memory_space<vmem>>, %arg2: memref<16x256xbf16, #tpu.memory_space<vmem>>, %arg3: memref<1x256xf32, #tpu.memory_space<vmem>>, %arg4: memref<256x256xbf16, #tpu.memory_space<vmem>>, %arg5: memref<1x256xf32, #tpu.memory_space<vmem>>, %arg6: memref<256x256xbf16, #tpu.memory_space<vmem>>, %arg7: memref<1x256xf32, #tpu.memory_space<vmem>>, %arg8: memref<8x128xf32, #tpu.memory_space<vmem>>, %arg9: memref<8x128xf32, #tpu.memory_space<vmem>>) attributes {dimension_semantics = [#tpu.dimension_semantics<parallel>], iteration_bounds = array<i64: 1>, scalar_prefetch = 0 : i64, scratch_operands = 0 : i64, tpu.core_type = #tpu.core_type<tc>, window_params = [{transform_indices = @transform_0, window_bounds = array<i64: 8, 16>}, {pipeline_mode = #tpu.pipeline_mode<synchronous>, transform_indices = @transform_1, window_bounds = array<i64: 16, 256>}, {pipeline_mode = #tpu.pipeline_mode<synchronous>, transform_indices = @transform_2, window_bounds = array<i64: 1, 256>}, {pipeline_mode = #tpu.pipeline_mode<synchronous>, transform_indices = @transform_3, window_bounds = array<i64: 256, 256>}, {pipeline_mode = #tpu.pipeline_mode<synchronous>, transform_indices = @transform_4, window_bounds = array<i64: 1, 256>}, {pipeline_mode = #tpu.pipeline_mode<synchronous>, transform_indices = @transform_5, window_bounds = array<i64: 256, 256>}, {pipeline_mode = #tpu.pipeline_mode<synchronous>, transform_indices = @transform_6, window_bounds = array<i64: 1, 256>}, {transform_indices = @transform_7, window_bounds = array<i64: 8, 128>}, {transform_indices = @transform_8, window_bounds = array<i64: 8, 128>}]} {
    %c0 = arith.constant 0 : index
    %c0_0 = arith.constant 0 : index
    %0 = vector.load %arg1[%c0, %c0_0] : memref<8x16xf32, #tpu.memory_space<vmem>>, vector<8x16xf32>
    %1 = arith.truncf %0 : vector<8x16xf32> to vector<8x16xbf16>
    %c0_1 = arith.constant 0 : index
    %c0_2 = arith.constant 0 : index
    %2 = vector.load %arg2[%c0_1, %c0_2] : memref<16x256xbf16, #tpu.memory_space<vmem>>, vector<16x256xbf16>
    %cst = arith.constant dense<0.000000e+00> : vector<8x256xf32>
    %3 = tpu.matmul %1, %2, %cst {dimension_numbers = #tpu.dot_dimension_numbers<[1], [0], [0], [1], [0, 0, 1, 1], [], []>} : vector<8x16xbf16>, vector<16x256xbf16>, vector<8x256xf32> -> vector<8x256xf32>
    %c0_3 = arith.constant 0 : index
    %c0_4 = arith.constant 0 : index
    %4 = vector.load %arg3[%c0_3, %c0_4] : memref<1x256xf32, #tpu.memory_space<vmem>>, vector<1x256xf32>
    %5 = vector.broadcast %4 : vector<1x256xf32> to vector<8x256xf32>
    %6 = arith.addf %3, %5 : vector<8x256xf32>
    %cst_5 = arith.constant 0.000000e+00 : f32
    %7 = vector.broadcast %cst_5 : f32 to vector<8x256xf32>
    %8 = arith.maximumf %6, %7 : vector<8x256xf32>
    %9 = arith.truncf %8 : vector<8x256xf32> to vector<8x256xbf16>
    %c0_6 = arith.constant 0 : index
    %c0_7 = arith.constant 0 : index
    %10 = vector.load %arg4[%c0_6, %c0_7] : memref<256x256xbf16, #tpu.memory_space<vmem>>, vector<256x256xbf16>
    %cst_8 = arith.constant dense<0.000000e+00> : vector<8x256xf32>
    %11 = tpu.matmul %9, %10, %cst_8 {dimension_numbers = #tpu.dot_dimension_numbers<[1], [0], [0], [1], [0, 0, 1, 1], [], []>} : vector<8x256xbf16>, vector<256x256xbf16>, vector<8x256xf32> -> vector<8x256xf32>
    %c0_9 = arith.constant 0 : index
    %c0_10 = arith.constant 0 : index
    %12 = vector.load %arg5[%c0_9, %c0_10] : memref<1x256xf32, #tpu.memory_space<vmem>>, vector<1x256xf32>
    %13 = vector.broadcast %12 : vector<1x256xf32> to vector<8x256xf32>
    %14 = arith.addf %11, %13 : vector<8x256xf32>
    %cst_11 = arith.constant 0.000000e+00 : f32
    %15 = vector.broadcast %cst_11 : f32 to vector<8x256xf32>
    %16 = arith.maximumf %14, %15 : vector<8x256xf32>
    %17 = arith.truncf %16 : vector<8x256xf32> to vector<8x256xbf16>
    %c0_12 = arith.constant 0 : index
    %c0_13 = arith.constant 0 : index
    %18 = vector.load %arg6[%c0_12, %c0_13] : memref<256x256xbf16, #tpu.memory_space<vmem>>, vector<256x256xbf16>
    %cst_14 = arith.constant dense<0.000000e+00> : vector<8x256xf32>
    %19 = tpu.matmul %17, %18, %cst_14 {dimension_numbers = #tpu.dot_dimension_numbers<[1], [0], [0], [1], [0, 0, 1, 1], [], []>} : vector<8x256xbf16>, vector<256x256xbf16>, vector<8x256xf32> -> vector<8x256xf32>
    %c0_15 = arith.constant 0 : index
    %c0_16 = arith.constant 0 : index
    %20 = vector.load %arg7[%c0_15, %c0_16] : memref<1x256xf32, #tpu.memory_space<vmem>>, vector<1x256xf32>
    %21 = vector.broadcast %20 : vector<1x256xf32> to vector<8x256xf32>
    %22 = arith.addf %19, %21 : vector<8x256xf32>
    %23 = vector.extract_strided_slice %22 {offsets = [0, 0], sizes = [8, 128], strides = [1, 1]} : vector<8x256xf32> to vector<8x128xf32>
    %24 = math.tanh %23 : vector<8x128xf32>
    %cst_17 = arith.constant 1.000000e+00 : f32
    %25 = vector.broadcast %cst_17 : f32 to vector<8x128xf32>
    %26 = arith.mulf %25, %24 : vector<8x128xf32>
    %27 = vector.extract_strided_slice %22 {offsets = [0, 128], sizes = [8, 128], strides = [1, 1]} : vector<8x256xf32> to vector<8x128xf32>
    %cst_18 = arith.constant 0.000000e+00 : f32
    %28 = vector.broadcast %cst_18 : f32 to vector<8x128xf32>
    %29 = arith.maximumf %27, %28 : vector<8x128xf32>
    %30 = vector.broadcast %cst_18 : f32 to vector<8x128xf32>
    %31 = arith.subf %27, %30 : vector<8x128xf32>
    %32 = arith.cmpf one, %31, %31 : vector<8x128xf32>
    %33 = vector.broadcast %cst_18 : f32 to vector<8x128xf32>
    %34 = arith.addf %27, %33 : vector<8x128xf32>
    %35 = math.absf %31 : vector<8x128xf32>
    %cst_19 = arith.constant 0.000000e+00 : f32
    %36 = vector.broadcast %cst_19 : f32 to vector<8x128xf32>
    %37 = arith.subf %36, %35 : vector<8x128xf32>
    %38 = math.exp %37 : vector<8x128xf32>
    %39 = math.log1p %38 : vector<8x128xf32>
    %40 = arith.addf %29, %39 : vector<8x128xf32>
    %41 = arith.select %32, %34, %40 : vector<8x128xi1>, vector<8x128xf32>
    %cst_20 = arith.constant 1.000000e-03 : f32
    %42 = vector.broadcast %cst_20 : f32 to vector<8x128xf32>
    %43 = arith.addf %41, %42 : vector<8x128xf32>
    %c0_21 = arith.constant 0 : index
    %c0_22 = arith.constant 0 : index
    %44 = vector.load %arg8[%c0_21, %c0_22] : memref<8x128xf32, #tpu.memory_space<vmem>>, vector<8x128xf32>
    %45 = arith.mulf %43, %44 : vector<8x128xf32>
    %46 = arith.addf %26, %45 : vector<8x128xf32>
    %cst_23 = arith.constant -1.000000e+00 : f32
    %cst_24 = arith.constant 1.000000e+00 : f32
    %47 = vector.broadcast %cst_23 : f32 to vector<8x128xf32>
    %48 = arith.maximumf %47, %46 : vector<8x128xf32>
    %49 = vector.broadcast %cst_24 : f32 to vector<8x128xf32>
    %50 = arith.minimumf %49, %48 : vector<8x128xf32>
    %c0_25 = arith.constant 0 : index
    %c0_26 = arith.constant 0 : index
    %51 = vector.load %arg9[%c0_25, %c0_26] : memref<8x128xf32, #tpu.memory_space<vmem>>, vector<8x128xf32>
    tpu.vector_store %arg9[%c0_25, %c0_26], %50 {strides = array<i32>} : memref<8x128xf32, #tpu.memory_space<vmem>>, vector<8x128xf32>,
    return
  }
  func.func @transform_0(%arg0: i32) -> (i32, i32) {
    %c0_i32 = arith.constant 0 : i32
    %c0_i32_0 = arith.constant 0 : i32
    return %arg0, %c0_i32 : i32, i32
  }
  func.func @transform_1(%arg0: i32) -> (i32, i32) {
    %c0_i32 = arith.constant 0 : i32
    %c0_i32_0 = arith.constant 0 : i32
    %c0_i32_1 = arith.constant 0 : i32
    return %c0_i32, %c0_i32_0 : i32, i32
  }
  func.func @transform_2(%arg0: i32) -> (i32, i32) {
    %c0_i32 = arith.constant 0 : i32
    %c0_i32_0 = arith.constant 0 : i32
    %c0_i32_1 = arith.constant 0 : i32
    return %c0_i32, %c0_i32_0 : i32, i32
  }
  func.func @transform_3(%arg0: i32) -> (i32, i32) {
    %c0_i32 = arith.constant 0 : i32
    %c0_i32_0 = arith.constant 0 : i32
    %c0_i32_1 = arith.constant 0 : i32
    return %c0_i32, %c0_i32_0 : i32, i32
  }
  func.func @transform_4(%arg0: i32) -> (i32, i32) {
    %c0_i32 = arith.constant 0 : i32
    %c0_i32_0 = arith.constant 0 : i32
    %c0_i32_1 = arith.constant 0 : i32
    return %c0_i32, %c0_i32_0 : i32, i32
  }
  func.func @transform_5(%arg0: i32) -> (i32, i32) {
    %c0_i32 = arith.constant 0 : i32
    %c0_i32_0 = arith.constant 0 : i32
    %c0_i32_1 = arith.constant 0 : i32
    return %c0_i32, %c0_i32_0 : i32, i32
  }
  func.func @transform_6(%arg0: i32) -> (i32, i32) {
    %c0_i32 = arith.constant 0 : i32
    %c0_i32_0 = arith.constant 0 : i32
    %c0_i32_1 = arith.constant 0 : i32
    return %c0_i32, %c0_i32_0 : i32, i32
  }
  func.func @transform_7(%arg0: i32) -> (i32, i32) {
    %c0_i32 = arith.constant 0 : i32
    %c0_i32_0 = arith.constant 0 : i32
    return %arg0, %c0_i32 : i32, i32
  }
  func.func @transform_8(%arg0: i32) -> (i32, i32) {
    %c0_i32 = arith.constant 0 : i32
    %c0_i32_0 = arith.constant 0 : i32
    return %arg0, %c0_i32 : i32, i32
  }
}

</mosaic_0001>

<bundles_post_ra>
// kernel: tpu_custom_call.1
= control target key start
LH: loop header
LB: loop body
LE: loop exit
PB: predicated region body
PF: predicated region fallthrough
CT: control target
= control target key end

     0   :  { %13 = vsyncpa [#allocation3], 0  ;;  %s1107_s0 = inlined_call_operand.hbm [shape: f32[8,16], index: 0, kind: input, shape index: {}]   ;;  %s1108_s1 = inlined_call_operand.hbm [shape: bf16[16,256], index: 1, kind: input, shape index: {}]   ;;  %s1109_s2 = inlined_call_operand.vmem [shape: f32[1,256], index: 2, kind: input, shape index: {}]   ;;  %s1110_s3 = inlined_call_operand.hbm [shape: bf16[256,256], index: 3, kind: input, shape index: {}]   ;;  %s1111_s4 = inlined_call_operand.vmem [shape: f32[1,256], index: 4, kind: input, shape index: {}]   ;;  %s1112_s5 = inlined_call_operand.hbm [shape: bf16[256,256], index: 5, kind: input, shape index: {}]   ;;  %s1113_s6 = inlined_call_operand.hbm [shape: f32[1,256], index: 6, kind: input, shape index: {}]   ;;  %s1114_s7 = inlined_call_operand.vmem [shape: f32[8,128], index: 7, kind: input, shape index: {}]   ;;  %s1115_s8 = inlined_call_operand.hbm [shape: f32[8,128], index: 8, kind: output, shape index: {}]  }
   0x1   :  { %14 = vsyncpa [#allocation6], 0 }
   0x2   :  { %15 = vsyncpa [#allocation9], 0 }
   0x3   :  { %16 = vsyncpa [#allocation4], 0  ;;  %s1017_s27 = smov [#allocation5]  }
   0x4   :  { %s32_s28 = sshll.u32 %s1017_s27, 4  ;;  %s33_s28 = int_to_ptr.vmem [resolvable:$true] %s32_s28 }
   0x5   :  { %s897_s29 = scalar_lea.vmem %s33_s28, 256  ;;  %p902_p1 = scmp.lt.s32.totalorder %s33_s28, %s33_s28 }
   0x6   :  { %p898_p0 = scmp.ne.s32.totalorder %s33_s28, %s897_s29  ;;  %p903_p2 = scmp.lt.s32.totalorder %s897_s29, %s897_s29 }
   0x8   :  { %p904_p3 = por %p903_p2, %p902_p1 }
   0xa   :  { %p905_p4 = pnand %p904_p3, %p898_p0 }
   0xc   :  { %908 = shalt.err (!%p905_p4)
}
   0xd   :  { %s1018_s30 = smov 128   ;;  %s1019_s9 = smov 8  }
   0xe   :  { %38 = dma.hbm_to_vmem [thread:$0]  %s1108_s1, 256, %s33_s28, [#allocation6], %s1018_s30, %s1018_s30, %s1019_s9  }
   0xf   :  { %s1020_s12 = smov [#allocation8]   ;;  %s1021_s14 = smov [#allocation2]  }
  0x10   :  { %s60_s13 = sshll.u32 %s1020_s12, 4  ;;  %s23_s15 = sshll.u32 %s1021_s14, 4  ;;  %s61_s13 = int_to_ptr.vmem [resolvable:$true] %s60_s13  ;;  %s24_s15 = int_to_ptr.vmem [resolvable:$true] %s23_s15 }
  0x11   :  { %s917_s16 = scalar_lea.vmem %s61_s13, 4096  ;;  %p922_p6 = scmp.lt.s32.totalorder %s61_s13, %s61_s13 }
  0x12   :  { %p918_p5 = scmp.ne.s32.totalorder %s61_s13, %s917_s16  ;;  %p923_p7 = scmp.lt.s32.totalorder %s917_s16, %s917_s16 }
  0x14   :  { %p924_p8 = por %p923_p7, %p922_p6 }
  0x16   :  { %p925_p9 = pnand %p924_p8, %p918_p5 }
  0x18   :  { %928 = shalt.err (!%p925_p9)
}
  0x19   :  { %66 = dma.hbm_to_vmem [thread:$0]  %s1112_s5, 4096, %s61_s13, [#allocation9], %s1018_s30, %s1018_s30, %s1019_s9  }
  0x1a   :  { %s937_s1 = scalar_lea.vmem %s24_s15, 128  ;;  %p942_p11 = scmp.lt.s32.totalorder %s24_s15, %s24_s15 }
  0x1b   :  { %p938_p10 = scmp.ne.s32.totalorder %s24_s15, %s937_s1  ;;  %p943_p12 = scmp.lt.s32.totalorder %s937_s1, %s937_s1 }
  0x1d   :  { %p944_p13 = por %p943_p12, %p942_p11 }
  0x1f   :  { %p945_p0 = pnand %p944_p13, %p938_p10 }
  0x21   :  { %948 = shalt.err (!%p945_p0)
}
  0x22   :  { %26 = dma.hbm_to_vmem [thread:$0]  %s1107_s0, 128, %s24_s15, [#allocation3]  }
  0x23   :  { %s1022_s21 = smov [#allocation7]   ;;  %s1023_s23 = smov [#allocation10]  }
  0x24   :  { %s46_s22 = sshll.u32 %s1022_s21, 4  ;;  %s73_s24 = sshll.u32 %s1023_s23, 4  ;;  %s47_s22 = int_to_ptr.vmem [resolvable:$true] %s46_s22  ;;  %s74_s24 = int_to_ptr.vmem [resolvable:$true] %s73_s24 }
  0x25   :  { %s957_s25 = scalar_lea.vmem %s47_s22, 4096  ;;  %p962_p2 = scmp.lt.s32.totalorder %s47_s22, %s47_s22 }
  0x26   :  { %p958_p1 = scmp.ne.s32.totalorder %s47_s22, %s957_s25  ;;  %p963_p3 = scmp.lt.s32.totalorder %s957_s25, %s957_s25 }
  0x28   :  { %p964_p4 = por %p963_p3, %p962_p2 }
  0x2a   :  { %p965_p5 = pnand %p964_p4, %p958_p1 }
  0x2c   :  { %968 = shalt.err (!%p965_p5)
}
  0x2d   :  { %52 = dma.hbm_to_vmem [thread:$0]  %s1110_s3, 4096, %s47_s22, [#allocation6], %s1018_s30, %s1018_s30, %s1019_s9  }
  0x2e   :  { %s977_s0 = scalar_lea.vmem %s74_s24, 32  ;;  %p982_p7 = scmp.lt.s32.totalorder %s74_s24, %s74_s24 }
  0x2f   :  { %p978_p6 = scmp.ne.s32.totalorder %s74_s24, %s977_s0  ;;  %p983_p8 = scmp.lt.s32.totalorder %s977_s0, %s977_s0 }
  0x31   :  { %p984_p9 = por %p983_p8, %p982_p7 }
  0x33   :  { %p985_p10 = pnand %p984_p9, %p978_p6 }
  0x35   :  { %988 = shalt.err (!%p985_p10)
}
  0x36   :  { %76 = dma.hbm_to_vmem [thread:$0]  %s1113_s6, 32, %s74_s24, [#allocation9]  }
  0x37   :  { %1009 = dma.done.wait [#allocation3], 128  }
  0x38   :  { %1010 = vsyncadd [#allocation3], 4294967168 }
  0x39   :  { %1011 = dma.done.wait [#allocation6], 4352  }
  0x3a   :  { %1012 = vsyncadd [#allocation6], 4294962944 }
  0x3b   :  { %1013 = dma.done.wait [#allocation9], 4128  }
  0x3c   :  { %1014 = vsyncadd [#allocation9], 4294963168  ;;  %v1024_v0 = vmov 0   ;;  %v784_v1 = vld [vmem:[#allocation5 + $0x4] ss:$8 sps:$4 sm:$0xff]   ;;  %v95_v3 = vld [vmem:[#allocation2] sm:$0xff] }
  0x3d   :  { %157 = vmatprep.mubr.bf16.mxu0 %v1024_v0  ;;  %v786_v2 = vld [vmem:[#allocation5] ss:$8 sps:$4 sm:$0xff]   ;;  %139 = vmatprep.subr.bf16.mxu0 %v784_v1  ;;  %v96_v4 = vpack.c.bf16 %v95_v3, %v95_v3  ;;  %v787_v5 = vld [vmem:[#allocation7 + $0x74] ss:$8 sps:$4 sm:$0xff]   ;;  %vm121_vm0 = vcmask 130048   ;;  %v101_v1 = vlaneseq  ;;  %s1025_s9 = smov [#allocation11]  }
  0x3e   :  { %v789_v6 = vld [vmem:[#allocation7 + $0x70] ss:$8 sps:$4 sm:$0xff]   ;;  %140 = vmatpush1.bf16.msra.mxu0 %v786_v2  ;;  %v790_v7 = vld [vmem:[#allocation7 + $0x64] ss:$8 sps:$4 sm:$0xff]   ;;  %374 = vmatprep.subr.bf16.mxu1 %v787_v5  ;;  %v792_v8 = vld [vmem:[#allocation7 + $0x60] ss:$8 sps:$4 sm:$0xff]  }
  0x3f   :  { %375 = vmatpush1.bf16.msra.mxu1 %v789_v6  ;;  %v793_v9 = vld [vmem:[#allocation7 + $0x54] ss:$8 sps:$4 sm:$0xff]   ;;  %v795_v10 = vld [vmem:[#allocation7 + $0x50] ss:$8 sps:$4 sm:$0xff]   ;;  %v796_v11 = vld [vmem:[#allocation7 + $0x44] ss:$8 sps:$4 sm:$0xff]  }
  0x40   :  { %376 = vmatprep.subr.bf16.mxu1 %v790_v7  ;;  %v798_v12 = vld [vmem:[#allocation7 + $0x40] ss:$8 sps:$4 sm:$0xff]   ;;  %v799_v13 = vld [vmem:[#allocation7 + $0x34] ss:$8 sps:$4 sm:$0xff]   ;;  %v801_v14 = vld [vmem:[#allocation7 + $0x30] ss:$8 sps:$4 sm:$0xff]  }
  0x41   :  { %709 = vmatmul.mubr.msk.bf16.vlgmr.msra.gmra.mxu0 %vm121_vm0, %v96_v4  ;;  %v802_v15 = vld [vmem:[#allocation7 + $0x24] ss:$8 sps:$4 sm:$0xff]   ;;  %v804_v16 = vld [vmem:[#allocation7 + $0x20] ss:$8 sps:$4 sm:$0xff]   ;;  %v805_v17 = vld [vmem:[#allocation7 + $0x14] ss:$8 sps:$4 sm:$0xff]  }
  0x42   :  { %v807_v18 = vld [vmem:[#allocation7 + $0x10] ss:$8 sps:$4 sm:$0xff]   ;;  %v808_v19 = vld [vmem:[#allocation7 + $0x4] ss:$8 sps:$4 sm:$0xff]   ;;  %v810_v20 = vld [vmem:[#allocation7] ss:$8 sps:$4 sm:$0xff]  }
  0x43   :  { %377 = vmatpush1.bf16.msra.mxu1 %v792_v8  ;;  %v811_v21 = vld [vmem:[#allocation7 + $0xf4] ss:$8 sps:$4 sm:$0xff]   ;;  %v813_v22 = vld [vmem:[#allocation7 + $0xf0] ss:$8 sps:$4 sm:$0xff]   ;;  %v814_v23 = vld [vmem:[#allocation7 + $0xe4] ss:$8 sps:$4 sm:$0xff]  }
  0x44   :  { %378 = vmatprep.subr.bf16.mxu1 %v793_v9  ;;  %v816_v24 = vld [vmem:[#allocation7 + $0xe0] ss:$8 sps:$4 sm:$0xff]   ;;  %v817_v25 = vld [vmem:[#allocation7 + $0xd4] ss:$8 sps:$4 sm:$0xff]   ;;  %v819_v26 = vld [vmem:[#allocation7 + $0xd0] ss:$8 sps:$4 sm:$0xff]  }
  0x45   :  { %v820_v27 = vld [vmem:[#allocation7 + $0xc4] ss:$8 sps:$4 sm:$0xff]   ;;  %v822_v28 = vld [vmem:[#allocation7 + $0xc0] ss:$8 sps:$4 sm:$0xff]   ;;  %v823_v29 = vld [vmem:[#allocation7 + $0xb4] ss:$8 sps:$4 sm:$0xff]  }
  0x46   :  { %v825_v30 = vld [vmem:[#allocation7 + $0xb0] ss:$8 sps:$4 sm:$0xff]   ;;  %v826_v31 = vld [vmem:[#allocation7 + $0xa4] ss:$8 sps:$4 sm:$0xff]   ;;  %v828_v32 = vld [vmem:[#allocation7 + $0xa0] ss:$8 sps:$4 sm:$0xff]  }
  0x47   :  { %379 = vmatpush1.bf16.msra.mxu1 %v795_v10  ;;  %v829_v33 = vld [vmem:[#allocation7 + $0x94] ss:$8 sps:$4 sm:$0xff]   ;;  %v831_v34 = vld [vmem:[#allocation7 + $0x90] ss:$8 sps:$4 sm:$0xff]   ;;  %v832_v35 = vld [vmem:[#allocation7 + $0x84] ss:$8 sps:$4 sm:$0xff]  }
  0x48   :  { %380 = vmatprep.subr.bf16.mxu1 %v796_v11  ;;  %v834_v36 = vld [vmem:[#allocation7 + $0x80] ss:$8 sps:$4 sm:$0xff]   ;;  %v835_v37 = vld [vmem:[#allocation8 + $0x70] ss:$8 sps:$4 sm:$0xff]   ;;  %v837_v38 = vld [vmem:[#allocation8 + $0x74] ss:$8 sps:$4 sm:$0xff]  }
  0x49   :  { %v840_v39 = vld [vmem:[#allocation8 + $0x64] ss:$8 sps:$4 sm:$0xff]   ;;  %623 = vmatprep.subr.bf16.mxu0 %v837_v38  ;;  %v838_v40 = vld [vmem:[#allocation8 + $0x60] ss:$8 sps:$4 sm:$0xff]   ;;  %v843_v41 = vld [vmem:[#allocation8 + $0x54] ss:$8 sps:$4 sm:$0xff]  }
  0x4a   :  { %624 = vmatpush1.bf16.msra.mxu0 %v835_v37  ;;  %v841_v42 = vld [vmem:[#allocation8 + $0x50] ss:$8 sps:$4 sm:$0xff]   ;;  %v846_v43 = vld [vmem:[#allocation8 + $0x44] ss:$8 sps:$4 sm:$0xff]   ;;  %v844_v44 = vld [vmem:[#allocation8 + $0x40] ss:$8 sps:$4 sm:$0xff]  }
  0x4b   :  { %381 = vmatpush1.bf16.msra.mxu1 %v798_v12  ;;  %625 = vmatprep.subr.bf16.mxu0 %v840_v39  ;;  %v849_v45 = vld [vmem:[#allocation8 + $0x34] ss:$8 sps:$4 sm:$0xff]   ;;  %v847_v46 = vld [vmem:[#allocation8 + $0x30] ss:$8 sps:$4 sm:$0xff]   ;;  %v852_v47 = vld [vmem:[#allocation8 + $0x24] ss:$8 sps:$4 sm:$0xff]  }
  0x4c   :  { %382 = vmatprep.subr.bf16.mxu1 %v799_v13  ;;  %v850_v48 = vld [vmem:[#allocation8 + $0x20] ss:$8 sps:$4 sm:$0xff]   ;;  %v855_v49 = vld [vmem:[#allocation8 + $0x14] ss:$8 sps:$4 sm:$0xff]   ;;  %v853_v50 = vld [vmem:[#allocation8 + $0x10] ss:$8 sps:$4 sm:$0xff]  }
  0x4d   :  { %v858_v51 = vld [vmem:[#allocation8 + $0x4] ss:$8 sps:$4 sm:$0xff]   ;;  %v856_v52 = vld [vmem:[#allocation8] ss:$8 sps:$4 sm:$0xff]   ;;  %v861_v53 = vld [vmem:[#allocation8 + $0xf4] ss:$8 sps:$4 sm:$0xff]  }
  0x4e   :  { %626 = vmatpush1.bf16.msra.mxu0 %v838_v40  ;;  %v859_v54 = vld [vmem:[#allocation8 + $0xf0] ss:$8 sps:$4 sm:$0xff]   ;;  %v864_v55 = vld [vmem:[#allocation8 + $0xe4] ss:$8 sps:$4 sm:$0xff]   ;;  %v862_v56 = vld [vmem:[#allocation8 + $0xe0] ss:$8 sps:$4 sm:$0xff]  }
  0x4f   :  { %383 = vmatpush1.bf16.msra.mxu1 %v801_v14  ;;  %627 = vmatprep.subr.bf16.mxu0 %v843_v41  ;;  %v867_v57 = vld [vmem:[#allocation8 + $0xd4] ss:$8 sps:$4 sm:$0xff]   ;;  %v865_v58 = vld [vmem:[#allocation8 + $0xd0] ss:$8 sps:$4 sm:$0xff]   ;;  %v870_v59 = vld [vmem:[#allocation8 + $0xc4] ss:$8 sps:$4 sm:$0xff]  }
  0x50   :  { %384 = vmatprep.subr.bf16.mxu1 %v802_v15  ;;  %v868_v60 = vld [vmem:[#allocation8 + $0xc0] ss:$8 sps:$4 sm:$0xff]   ;;  %v873_v61 = vld [vmem:[#allocation8 + $0xb4] ss:$8 sps:$4 sm:$0xff]   ;;  %v871_v62 = vld [vmem:[#allocation8 + $0xb0] ss:$8 sps:$4 sm:$0xff]  }
  0x51   :  { %v876_v63 = vld [vmem:[#allocation8 + $0xa4] ss:$8 sps:$4 sm:$0xff]   ;;  %v874_v0 = vld [vmem:[#allocation8 + $0xa0] ss:$8 sps:$4 sm:$0xff]   ;;  %v102_v2 = vshrl.u32 %v101_v1, 7  ;;  %s696_s10 = sshll.u32 %s1025_s9, 4  ;;  %s697_s10 = int_to_ptr.vmem [resolvable:$true] %s696_s10 }
  0x52   :  { %628 = vmatpush1.bf16.msra.mxu0 %v841_v42  ;;  %v99_v4 = vld [vmem:[%s1109_s2] sm:$0x3]  ;;  %s989_s11 = scalar_lea.vmem %s697_s10, 128  ;;  %p994_p12 = scmp.lt.s32.totalorder %s697_s10, %s697_s10 }
  0x53   :  { %385 = vmatpush1.bf16.msra.mxu1 %v804_v16  ;;  %629 = vmatprep.subr.bf16.mxu0 %v846_v43  ;;  %v103_v3 = vsub.s32 0, %v102_v2  ;;  %v107_v5 = vsub.s32 1, %v102_v2  ;;  %p990_p11 = scmp.ne.s32.totalorder %s697_s10, %s989_s11  ;;  %p995_p13 = scmp.lt.s32.totalorder %s989_s11, %s989_s11 }
  0x54   :  { %386 = vmatprep.subr.bf16.mxu1 %v805_v17 }
  0x55   :  { %v104_v6 = vrot.slane %v99_v4, %v103_v3  ;;  %v108_v7 = vrot.slane %v99_v4, %v107_v5  ;;  %p996_p0 = por %p995_p13, %p994_p12 }
  0x56   :  { %630 = vmatpush1.bf16.msra.mxu0 %v844_v44 }
  0x57   :  { %387 = vmatpush1.bf16.msra.mxu1 %v807_v18  ;;  %631 = vmatprep.subr.bf16.mxu0 %v849_v45  ;;  %v879_v18 = vld [vmem:[#allocation8 + $0x94] ss:$8 sps:$4 sm:$0xff]   ;;  %p997_p1 = pnand %p996_p0, %p990_p11 }
  0x58   :  { %388 = vmatprep.subr.bf16.mxu1 %v808_v19  ;;  %v877_v19 = vld [vmem:[#allocation8 + $0x90] ss:$8 sps:$4 sm:$0xff]  }
  0x5a   :  { %632 = vmatpush1.bf16.msra.mxu0 %v847_v46 }
  0x5b   :  { %389 = vmatpush1.bf16.msra.mxu1 %v810_v20  ;;  %633 = vmatprep.subr.bf16.mxu0 %v852_v47  ;;  %v882_v20 = vld [vmem:[#allocation8 + $0x84] ss:$8 sps:$4 sm:$0xff]  }
  0x5c   :  { %390 = vmatprep.subr.bf16.mxu1 %v811_v21  ;;  %v880_v21 = vld [vmem:[#allocation8 + $0x80] ss:$8 sps:$4 sm:$0xff]  }
  0x5e   :  { %634 = vmatpush1.bf16.msra.mxu0 %v850_v48 }
  0x5f   :  { %391 = vmatpush2.bf16.msra.mxu1 %v813_v22  ;;  %635 = vmatprep.subr.bf16.mxu0 %v855_v49  ;;  %v202_v22 = vld [vmem:[%s1111_s4] sm:$0x3] }
  0x60   :  { %392 = vmatprep.subr.bf16.mxu1 %v814_v23  ;;  %v207_v23 = vrot.slane %v202_v22, %v103_v3 }
  0x62   :  { %636 = vmatpush1.bf16.msra.mxu0 %v853_v50 }
  0x63   :  { %393 = vmatpush2.bf16.msra.mxu1 %v816_v24  ;;  %637 = vmatprep.subr.bf16.mxu0 %v858_v51  ;;  %v211_v24 = vrot.slane %v202_v22, %v107_v5 }
  0x64   :  { %394 = vmatprep.subr.bf16.mxu1 %v817_v25 }
  0x66   :  { %638 = vmatpush1.bf16.msra.mxu0 %v856_v52 }
  0x67   :  { %395 = vmatpush2.bf16.msra.mxu1 %v819_v26  ;;  %639 = vmatprep.subr.bf16.mxu0 %v861_v53 }
  0x68   :  { %396 = vmatprep.subr.bf16.mxu1 %v820_v27 }
  0x6a   :  { %640 = vmatpush2.bf16.msra.mxu0 %v859_v54 }
  0x6b   :  { %397 = vmatpush2.bf16.msra.mxu1 %v822_v28  ;;  %641 = vmatprep.subr.bf16.mxu0 %v864_v55 }
  0x6c   :  { %398 = vmatprep.subr.bf16.mxu1 %v823_v29 }
  0x6e   :  { %642 = vmatpush2.bf16.msra.mxu0 %v862_v56 }
  0x6f   :  { %399 = vmatpush2.bf16.msra.mxu1 %v825_v30  ;;  %643 = vmatprep.subr.bf16.mxu0 %v867_v57 }
  0x70   :  { %400 = vmatprep.subr.bf16.mxu1 %v826_v31 }
  0x72   :  { %644 = vmatpush2.bf16.msra.mxu0 %v865_v58 }
  0x73   :  { %401 = vmatpush2.bf16.msra.mxu1 %v828_v32  ;;  %645 = vmatprep.subr.bf16.mxu0 %v870_v59  ;;  %v684_v59 = vld [vmem:[%s1114_s7] sm:$0xff] }
  0x74   :  { %402 = vmatprep.subr.bf16.mxu1 %v829_v33 }
  0x76   :  { %646 = vmatpush2.bf16.msra.mxu0 %v868_v60 }
  0x77   :  { %403 = vmatpush2.bf16.msra.mxu1 %v831_v34  ;;  %647 = vmatprep.subr.bf16.mxu0 %v873_v61 }
  0x78   :  { %404 = vmatprep.subr.bf16.mxu1 %v832_v35  ;;  %v451_v35 = vld [vmem:[#allocation10] sm:$0x3] }
  0x79   :  { %v456_v47 = vrot.slane %v451_v35, %v103_v3 }
  0x7a   :  { %648 = vmatpush2.bf16.msra.mxu0 %v871_v62 }
  0x7b   :  { %405 = vmatpush2.bf16.msra.mxu1 %v834_v36  ;;  %649 = vmatprep.subr.bf16.mxu0 %v876_v63  ;;  %v460_v36 = vrot.slane %v451_v35, %v107_v5 }
  0x7e   :  { %650 = vmatpush2.bf16.msra.mxu0 %v874_v0 }
  0x7f   :  { %651 = vmatprep.subr.bf16.mxu0 %v879_v18 }
  0x82   :  { %652 = vmatpush2.bf16.msra.mxu0 %v877_v19 }
  0x83   :  { %653 = vmatprep.subr.bf16.mxu0 %v882_v20 }
  0x86   :  { %654 = vmatpush2.bf16.msra.mxu0 %v880_v21 }
 0x101   :  { %v159_v8 = vpop.f32.mrf.mxu0 }
 0x102   :  { %v160_v9 = vadd.f32 %v159_v8, %v104_v6 }
 0x103   :  { %v161_v10 = vpop.f32.mrf.mxu0 }
 0x104   :  { %v162_v11 = vadd.f32 %v161_v10, %v108_v7  ;;  %v166_v12 = vmax.f32 %v160_v9, 0.0 }
 0x105   :  { %v163_v13 = vpop.f32.mrf.mxu0 }
 0x106   :  { %v167_v14 = vmax.f32 %v162_v11, 0.0  ;;  %v168_v17 = vpack.c.bf16 %v166_v12, %v166_v12 }
 0x107   :  { %v164_v15 = vpop.f32.mrf.mxu0 }
 0x108   :  { %v169_v16 = vpack.c.bf16 %v167_v14, %v167_v14 }
 0x10a   :  { %406 = vmatprep.mubr.bf16.mxu1 %v169_v16 }
 0x10b   :  { %407 = vmatmul.mubr.bf16.vlgmr.msra.gmra.mxu1 %v168_v17 }
 0x1cb   :  { %v408_v25 = vpop.f32.mrf.mxu1 }
 0x1cc   :  { %v409_v26 = vadd.f32 %v408_v25, %v207_v23 }
 0x1cd   :  { %v410_v27 = vpop.f32.mrf.mxu1 }
 0x1ce   :  { %v411_v28 = vadd.f32 %v410_v27, %v211_v24  ;;  %v415_v29 = vmax.f32 %v409_v26, 0.0 }
 0x1cf   :  { %v412_v30 = vpop.f32.mrf.mxu1 }
 0x1d0   :  { %v416_v31 = vmax.f32 %v411_v28, 0.0  ;;  %v417_v34 = vpack.c.bf16 %v415_v29, %v415_v29 }
 0x1d1   :  { %v413_v32 = vpop.f32.mrf.mxu1 }
 0x1d2   :  { %v418_v33 = vpack.c.bf16 %v416_v31, %v416_v31 }
 0x1d4   :  { %655 = vmatprep.mubr.bf16.mxu0 %v418_v33 }
 0x1d5   :  { %656 = vmatmul.mubr.bf16.vlgmr.msra.gmra.mxu0 %v417_v34 }
 0x295   :  { %v657_v37 = vpop.f32.mrf.mxu0 }
 0x296   :  { %v658_v48 = vadd.f32 %v657_v37, %v456_v47 }
 0x297   :  { %v659_v38 = vpop.f32.mrf.mxu0 }
 0x298   :  { %v660_v39 = vadd.f32 %v659_v38, %v460_v36 }
 0x299   :  { %v661_v40 = vpop.f32.mrf.mxu0 }
 0x29a   :  { %v668_v41 = vand.u32 2147483647, %v660_v39  ;;  %v665_v55 = vmax.f32 %v660_v39, 0.0  ;;  %vm666_vm2 = vcmp.ne.f32.partialorder %v660_v39, %v660_v39 }
 0x29b   :  { %v662_v42 = vpop.f32.mrf.mxu0 }
 0x29c   :  { %v669_v43 = vsub.f32 0.0, %v668_v41 }
 0x29e   :  { %v670_v44 = vmul.f32 1.442695, %v669_v43 }
 0x2a0   :  { %883 = vpow2.f32 %v670_v44 }
 0x2ad   :  { %v884_v45 = vpop.eup %883 }
 0x2ae   :  { %v672_v46 = vadd.f32 1.0, %v884_v45  ;;  %v675_v49 = vmul.f32 -0.5, %v884_v45  ;;  %v678_v51 = vand.u32 2147483647, %v884_v45 }
 0x2b0   :  { %885 = vlog2.f32 %v672_v46  ;;  %v676_v50 = vadd.f32 1.0, %v675_v49  ;;  %vm679_vm1 = vcmp.lt.f32.partialorder %v678_v51, 0.0004427343 }
 0x2b1   :  { %887 = vtanh.f32 %v658_v48 }
 0x2b2   :  { %v677_v54 = vmul.f32 %v884_v45, %v676_v50 }
 0x2bd   :  { %v886_v52 = vpop.eup %885 }
 0x2be   :  { %v674_v53 = vmul.f32 0.6931472, %v886_v52  ;;  %v888_v62 = vpop.eup %887 }
 0x2c0   :  { %v680_v56 = vsel %vm679_vm1, %v677_v54, %v674_v53 }
 0x2c1   :  { %v681_v57 = vadd.f32 %v680_v56, %v665_v55 }
 0x2c3   :  { %v682_v58 = vsel %vm666_vm2, %v660_v39, %v681_v57 }
 0x2c4   :  { %v683_v60 = vadd.f32 0.001, %v682_v58 }
 0x2c6   :  { %v685_v61 = vmul.f32 %v684_v59, %v683_v60 }
 0x2c8   :  { %v686_v63 = vadd.f32 %v888_v62, %v685_v61 }
 0x2ca   :  { %v774_v0 = vclamps-f32 %v686_v63, 1.0 }
 0x2cc   :  { %689 = vst [vmem:[#allocation11] sm:$0xff] %v774_v0 }
 0x2cd   :  { %1000 = shalt.err (!%p997_p1)
}
 0x2ce   :  { %699 = dma.vmem_to_hbm [thread:$0]  %s697_s10, 128, %s1115_s8, [#allocation4]  }
 0x2cf   :  { %1015 = dma.done.wait [#allocation4], 128  }
 0x2d0   :  { %1016 = vsyncadd [#allocation4], 4294967168 }
 0x2d1   :  { %703 = vsyncpa [#allocation3], 1 }
 0x2d2   :  { %704 = vsyncpa [#allocation6], 1 }
 0x2d3   :  { %705 = vsyncpa [#allocation9], 1 }
 0x2d4   :  { %706 = vsyncpa [#allocation4], 1 }

</bundles_post_ra>
